<compile_context>
chip_gen: v7x
topology: tpu7x:2x2x1
jax: 0.10.0
libtpu: 0.0.40
codegen_flags: <defaults>
</compile_context>

<pallas_src>
import jax
import jax.numpy as jnp
from jax import lax
from jax.experimental import pallas as pl
from jax.experimental.pallas import tpu as pltpu

BN_EPS = 1e-4


def _conv_bn_relu_kernel(x_ref, w_ref, b_ref, o_ref):
  """One H-tile: x_ref (1, TH+2, W+2, Cin) -> o_ref (1, TH, W, Cout)."""
  xp = x_ref[0]                                  # (TH+2, W+2, Cin), pre-padded
  thp2, wp, cin = xp.shape
  th, tw = thp2 - 2, wp - 2

  # im2col: gather the 9 taps into one (TH*W, 9*Cin) slab so the whole conv is
  # a single MXU matmul with a 9*Cin-deep contraction.  Tap order (ki, kj, cin)
  # matches the (3, 3, Cin, Cout) -> (9*Cin, Cout) weight reshape in the
  # wrapper.
  taps = []
  for ki in range(3):
    for kj in range(3):
      taps.append(xp[ki:ki + th, kj:kj + tw, :].reshape(th * tw, cin))
  slab = jnp.concatenate(taps, axis=-1)          # (TH*W, 9*Cin)

  acc = jnp.dot(slab, w_ref[...], preferred_element_type=jnp.float32)
  # BN scale is already folded into the weight; only bias + relu remain.
  y = jnp.maximum(acc + b_ref[...], 0.0)
  o_ref[0] = y.reshape(th, tw, -1).astype(o_ref.dtype)


def _pick_tile_h(h, target=64):
  """Largest divisor of H that is <= target (keeps per-tile VMEM bounded)."""
  best = 1
  for d in range(1, h + 1):
    if h % d == 0 and d <= target:
      best = d
  return best


def conv_bn_relu_pallas(x_nchw, params, tile_h=None):
  """x_nchw: (N, Cin, H, W) float32.  Returns relu(bn(conv3x3(x))) in NCHW."""
  n, cin, h, w = x_nchw.shape
  w_hwio = params["w"]                                           # (3,3,Cin,Cout)
  cout = w_hwio.shape[-1]

  # ---- fold inference-mode BatchNorm into the conv weight and a bias --------
  scale = params["gamma"] * lax.rsqrt(params["var"] + BN_EPS)    # (Cout,)
  bias = (params["beta"] - params["mean"] * scale).reshape(1, cout)
  w_folded = (w_hwio * scale).reshape(9 * cin, cout)             # (9*Cin, Cout)

  # ---- layout: NCHW -> NHWC, pre-pad the halo, tile along H -----------------
  th = tile_h if tile_h is not None else _pick_tile_h(h)
  assert h % th == 0, f"tile_h={th} must divide H={h}"
  n_tiles = h // th

  x = jnp.transpose(x_nchw, (0, 2, 3, 1))                        # (N, H, W, Cin)
  x_pad = jnp.pad(x, ((0, 0), (1, 1), (1, 1), (0, 0)))           # (N, H+2, W+2, Cin)
  # Duplicate the 2 halo rows per tile host-side so plain blocked BlockSpecs
  # (no overlapping windows) are enough inside the kernel.
  x_tiles = jnp.stack(
      [x_pad[:, t * th:t * th + th + 2] for t in range(n_tiles)], axis=1
  ).reshape(n * n_tiles, th + 2, w + 2, cin)

  flops = 2 * n * h * w * (9 * cin) * cout
  bytes_accessed = 4 * (x_tiles.size + w_folded.size + bias.size
                        + n * h * w * cout)

  grid_spec = pltpu.PrefetchScalarGridSpec(
      num_scalar_prefetch=0,
      grid=(n * n_tiles,),
      in_specs=[
          pl.BlockSpec((1, th + 2, w + 2, cin), lambda i: (i, 0, 0, 0)),
          pl.BlockSpec((9 * cin, cout), lambda i: (0, 0)),
          pl.BlockSpec((1, cout), lambda i: (0, 0)),
      ],
      out_specs=pl.BlockSpec((1, th, w, cout), lambda i: (i, 0, 0, 0)),
  )

  y_tiles = pl.pallas_call(
      _conv_bn_relu_kernel,
      out_shape=jax.ShapeDtypeStruct((n * n_tiles, th, w, cout), jnp.float32),
      grid_spec=grid_spec,
      compiler_params=pltpu.CompilerParams(dimension_semantics=("parallel",)),
      cost_estimate=pl.CostEstimate(
          flops=flops, transcendentals=0, bytes_accessed=bytes_accessed),
  )(x_tiles, w_folded, bias)

  y = y_tiles.reshape(n, h, w, cout)
  # TODO(synk): callers that consume NHWC could skip this transpose entirely.
  return jnp.transpose(y, (0, 3, 1, 2))


def make_params(key, in_channels, out_channels):
  ks = jax.random.split(key, 5)
  w = 0.1 * jax.random.normal(ks[0], (3, 3, in_channels, out_channels),
                              jnp.float32)
  gamma = 1.0 + 0.1 * jax.random.normal(ks[1], (out_channels,), jnp.float32)
  beta = 0.1 * jax.random.normal(ks[2], (out_channels,), jnp.float32)
  # Inference-mode BN running statistics (a fresh nn.BatchNorm2d has mean=0,
  # var=1; non-trivial values are used here to exercise the folding).
  mean = 0.1 * jax.random.normal(ks[3], (out_channels,), jnp.float32)
  var = 0.5 + jax.random.uniform(ks[4], (out_channels,), jnp.float32)
  # TODO(synk): training-mode BatchNorm (batch statistics) would need a
  # cross-image reduction pass and is not implemented.
  return {"w": w, "gamma": gamma, "beta": beta, "mean": mean, "var": var}


def conv_bn_relu_reference(x_nchw, params):
  """Plain-JAX reference (same math, default precision) for correctness."""
  x = jnp.transpose(x_nchw, (0, 2, 3, 1))
  y = lax.conv_general_dilated(
      x, params["w"], window_strides=(1, 1), padding="SAME",
      dimension_numbers=("NHWC", "HWIO", "NHWC"))
  scale = params["gamma"] / jnp.sqrt(params["var"] + BN_EPS)
  y = jnp.maximum(y * scale + (params["beta"] - params["mean"] * scale), 0.0)
  return jnp.transpose(y, (0, 3, 1, 2))


if __name__ == "__main__":
  key = jax.random.PRNGKey(0)
  k_x, k_p = jax.random.split(key)

  N, Cin, H, W = 2, 4, 16, 16
  Cout = 8
  x = jax.random.normal(k_x, (N, Cin, H, W), jnp.float32)
  params = make_params(k_p, Cin, Cout)

  y = conv_bn_relu_pallas(x, params, tile_h=8)   # 2 H-tiles per image
  y = jax.block_until_ready(y)

  y_ref = conv_bn_relu_reference(x, params)
  assert y.shape == (N, Cout, H, W)
  # Both kernel and reference run at default (bf16-input, f32-accumulate) MXU
  # precision; the tolerance covers accumulation-order / BN-fold rounding.
  max_err = float(jnp.max(jnp.abs(y - y_ref)))
  assert jnp.allclose(y, y_ref, atol=1e-2, rtol=1e-2), max_err

  print("KERNEL_OK")
</pallas_src>

<mosaic_0001>
module attributes {stable_mosaic.version = 11 : i64} {
  func.func @_conv_bn_relu_kernel(%arg0: i32, %arg1: memref<1x10x18x4xf32, #tpu.memory_space<vmem>>, %arg2: memref<36x8xf32, #tpu.memory_space<vmem>>, %arg3: memref<1x8xf32, #tpu.memory_space<vmem>>, %arg4: memref<1x8x16x8xf32, #tpu.memory_space<vmem>>) attributes {dimension_semantics = [#tpu.dimension_semantics<parallel>], iteration_bounds = array<i64: 4>, scalar_prefetch = 0 : i64, scratch_operands = 0 : i64, tpu.core_type = #tpu.core_type<tc>, window_params = [{transform_indices = @transform_0, window_bounds = array<i64: 1, 10, 18, 4>}, {pipeline_mode = #tpu.pipeline_mode<synchronous>, transform_indices = @transform_1, window_bounds = array<i64: 36, 8>}, {pipeline_mode = #tpu.pipeline_mode<synchronous>, transform_indices = @transform_2, window_bounds = array<i64: 1, 8>}, {transform_indices = @transform_3, window_bounds = array<i64: 1, 8, 16, 8>}]} {
    %c0 = arith.constant 0 : index
    %c0_0 = arith.constant 0 : index
    %c0_1 = arith.constant 0 : index
    %c0_2 = arith.constant 0 : index
    %0 = vector.load %arg1[%c0, %c0_0, %c0_1, %c0_2] : memref<1x10x18x4xf32, #tpu.memory_space<vmem>>, vector<1x10x18x4xf32>
    %1 = vector.shape_cast %0 : vector<1x10x18x4xf32> to vector<10x18x4xf32>
    %2 = vector.extract_strided_slice %1 {offsets = [0, 0, 0], sizes = [8, 16, 4], strides = [1, 1, 1]} : vector<10x18x4xf32> to vector<8x16x4xf32>
    %3 = vector.shape_cast %2 : vector<8x16x4xf32> to vector<128x4xf32>
    %4 = vector.extract_strided_slice %1 {offsets = [0, 1, 0], sizes = [8, 16, 4], strides = [1, 1, 1]} : vector<10x18x4xf32> to vector<8x16x4xf32>
    %5 = vector.shape_cast %4 : vector<8x16x4xf32> to vector<128x4xf32>
    %6 = vector.extract_strided_slice %1 {offsets = [0, 2, 0], sizes = [8, 16, 4], strides = [1, 1, 1]} : vector<10x18x4xf32> to vector<8x16x4xf32>
    %7 = vector.shape_cast %6 : vector<8x16x4xf32> to vector<128x4xf32>
    %8 = vector.extract_strided_slice %1 {offsets = [1, 0, 0], sizes = [8, 16, 4], strides = [1, 1, 1]} : vector<10x18x4xf32> to vector<8x16x4xf32>
    %9 = vector.shape_cast %8 : vector<8x16x4xf32> to vector<128x4xf32>
    %10 = vector.extract_strided_slice %1 {offsets = [1, 1, 0], sizes = [8, 16, 4], strides = [1, 1, 1]} : vector<10x18x4xf32> to vector<8x16x4xf32>
    %11 = vector.shape_cast %10 : vector<8x16x4xf32> to vector<128x4xf32>
    %12 = vector.extract_strided_slice %1 {offsets = [1, 2, 0], sizes = [8, 16, 4], strides = [1, 1, 1]} : vector<10x18x4xf32> to vector<8x16x4xf32>
    %13 = vector.shape_cast %12 : vector<8x16x4xf32> to vector<128x4xf32>
    %14 = vector.extract_strided_slice %1 {offsets = [2, 0, 0], sizes = [8, 16, 4], strides = [1, 1, 1]} : vector<10x18x4xf32> to vector<8x16x4xf32>
    %15 = vector.shape_cast %14 : vector<8x16x4xf32> to vector<128x4xf32>
    %16 = vector.extract_strided_slice %1 {offsets = [2, 1, 0], sizes = [8, 16, 4], strides = [1, 1, 1]} : vector<10x18x4xf32> to vector<8x16x4xf32>
    %17 = vector.shape_cast %16 : vector<8x16x4xf32> to vector<128x4xf32>
    %18 = vector.extract_strided_slice %1 {offsets = [2, 2, 0], sizes = [8, 16, 4], strides = [1, 1, 1]} : vector<10x18x4xf32> to vector<8x16x4xf32>
    %19 = vector.shape_cast %18 : vector<8x16x4xf32> to vector<128x4xf32>
    %20 = tpu.concatenate %3, %5, %7, %9, %11, %13, %15, %17, %19 in 1 : vector<128x4xf32>, vector<128x4xf32>, vector<128x4xf32>, vector<128x4xf32>, vector<128x4xf32>, vector<128x4xf32>, vector<128x4xf32>, vector<128x4xf32>, vector<128x4xf32> -> vector<128x36xf32>
    %c0_3 = arith.constant 0 : index
    %c0_4 = arith.constant 0 : index
    %21 = vector.load %arg2[%c0_3, %c0_4] : memref<36x8xf32, #tpu.memory_space<vmem>>, vector<36x8xf32>
    %cst = arith.constant dense<0.000000e+00> : vector<128x8xf32>
    %22 = tpu.matmul %20, %21, %cst {dimension_numbers = #tpu.dot_dimension_numbers<[1], [0], [0], [1], [0, 0, 1, 1], [], []>} : vector<128x36xf32>, vector<36x8xf32>, vector<128x8xf32> -> vector<128x8xf32>
    %c0_5 = arith.constant 0 : index
    %c0_6 = arith.constant 0 : index
    %23 = vector.load %arg3[%c0_5, %c0_6] : memref<1x8xf32, #tpu.memory_space<vmem>>, vector<1x8xf32>
    %24 = vector.broadcast %23 : vector<1x8xf32> to vector<128x8xf32>
    %25 = arith.addf %22, %24 : vector<128x8xf32>
    %cst_7 = arith.constant 0.000000e+00 : f32
    %26 = vector.broadcast %cst_7 : f32 to vector<128x8xf32>
    %27 = arith.maximumf %25, %26 : vector<128x8xf32>
    %28 = vector.shape_cast %27 : vector<128x8xf32> to vector<8x16x8xf32>
    %c0_8 = arith.constant 0 : index
    %c0_9 = arith.constant 0 : index
    %c0_10 = arith.constant 0 : index
    %c0_11 = arith.constant 0 : index
    %29 = vector.load %arg4[%c0_8, %c0_9, %c0_10, %c0_11] : memref<1x8x16x8xf32, #tpu.memory_space<vmem>>, vector<1x8x16x8xf32>
    %30 = vector.shape_cast %29 : vector<1x8x16x8xf32> to vector<8x16x8xf32>
    %31 = vector.shape_cast %28 : vector<8x16x8xf32> to vector<1x8x16x8xf32>
    tpu.vector_store %arg4[%c0_8, %c0_9, %c0_10, %c0_11], %31 {strides = array<i32>} : memref<1x8x16x8xf32, #tpu.memory_space<vmem>>, vector<1x8x16x8xf32>,
    return
  }
  func.func @transform_0(%arg0: i32) -> (i32, i32, i32, i32) {
    %c0_i32 = arith.constant 0 : i32
    %c0_i32_0 = arith.constant 0 : i32
    %c0_i32_1 = arith.constant 0 : i32
    %c0_i32_2 = arith.constant 0 : i32
    return %arg0, %c0_i32, %c0_i32_0, %c0_i32_1 : i32, i32, i32, i32
  }
  func.func @transform_1(%arg0: i32) -> (i32, i32) {
    %c0_i32 = arith.constant 0 : i32
    %c0_i32_0 = arith.constant 0 : i32
    %c0_i32_1 = arith.constant 0 : i32
    return %c0_i32, %c0_i32_0 : i32, i32
  }
  func.func @transform_2(%arg0: i32) -> (i32, i32) {
    %c0_i32 = arith.constant 0 : i32
    %c0_i32_0 = arith.constant 0 : i32
    %c0_i32_1 = arith.constant 0 : i32
    return %c0_i32, %c0_i32_0 : i32, i32
  }
  func.func @transform_3(%arg0: i32) -> (i32, i32, i32, i32) {
    %c0_i32 = arith.constant 0 : i32
    %c0_i32_0 = arith.constant 0 : i32
    %c0_i32_1 = arith.constant 0 : i32
    %c0_i32_2 = arith.constant 0 : i32
    return %arg0, %c0_i32, %c0_i32_0, %c0_i32_1 : i32, i32, i32, i32
  }
}

</mosaic_0001>

<bundles_post_ra>
// kernel: tpu_custom_call.1
= control target key start
LH: loop header
LB: loop body
LE: loop exit
PB: predicated region body
PF: predicated region fallthrough
CT: control target
= control target key end

     0   :  { %s1301_s12 = smov 0   ;;  %s2002_s0 = inlined_call_operand.vmem [shape: f32[4,10,18,4], index: 0, kind: input, shape index: {}]   ;;  %s2003_s1 = inlined_call_operand.vmem [shape: f32[36,8], index: 1, kind: input, shape index: {}]   ;;  %s2004_s2 = inlined_call_operand.vmem [shape: f32[1,8], index: 2, kind: input, shape index: {}]   ;;  %s2005_s3 = inlined_call_operand.vmem [shape: f32[4,8,16,8], index: 3, kind: output, shape index: {}]  }
   0x1 LB: > { %s1150_s13 = sadd.s32 4294967295, %s1271_s12   ;;  %p1154_p0 = scmp.ge.s32.totalorder %s1271_s12, 1  ;;  %s1271_s12 = sphi %s1301_s12, %s13_s12  }
   0x2   : > { %p137_p1 = scmp.lt.s32.totalorder %s1271_s12, 5 }
   0x4   : > { %p138_p2 = pnand %p1154_p0, %p137_p1 }
   0x6   : > { %141 = sbr.rel (%p138_p2) target bundleno = 610 (0x262), region = 32 }
   0xd   : > { %p161_p3 = scmp.lt.s32.totalorder %s1150_s13, 3  ;;  %vm225_vm0 = vcmask 1046528   ;;  %s1273_s18 = smov 4   ;;  %vm266_vm1 = vcmask 1045504   ;;  %vm914_vm2 = vcmask 1043456   ;;  %vm717_vm3 = vcmask 31744  }
   0xe   : > { %s1274_s19 = smov 8   ;;  %s1275_s20 = smov 12   ;;  %vm734_vm4 = vcmask 64512   ;;  %vm751_vm5 = vcmask 97280   ;;  %vm768_vm6 = vcmask 130048   ;;  %vm785_vm7 = vcmask 162816  }
   0xf   : > { %s2034_s13 = smov (!%p161_p3, %s1150_s13), 3  ;;  %s1276_s21 = smov 16   ;;  %vm802_vm8 = vcmask 195584   ;;  %vm819_vm9 = vcmask 228352   ;;  %vm836_vm10 = vcmask 261120   ;;  %vm865_vm11 = vcmask 293888  }
  0x10   : > { %s1248_s14 = smul.u32 240, %s2034_s13  ;;  %s1277_s22 = smov 20  }
  0x11   : > { %s1278_s23 = smov 24   ;;  %s1279_s24 = smov 28  }
  0x12   : > { %s1315_s17 = scalar_lea.vmem %s2002_s0, %s1248_s14  ;;  %s1280_s6 = smov 32  }
  0x13   : > { %v1318_v0 = vld [vmem:[%s1315_s17 + $0x8] sm:$0xff]  ;;  %v173_v1 = vld [vmem:[%s1315_s17 + $0x10] sm:$0x3]  ;;  %v1322_v2 = vld [vmem:[%s1315_s17] sm:$0xff]  ;;  %s1178_s11 = sshll.u32 %s2034_s13, 7 }
  0x14   : > { %v227_v3 = vrot.slane %v1318_v0, 1  ;;  %v229_v4 = vrot.slane %v173_v1, 1  ;;  %v226_v5 = vrot.slane %v1322_v2, 1  ;;  %v1327_v6 = vld [vmem:[%s1315_s17 + $0x68] sm:$0xff]  ;;  %v185_v7 = vld [vmem:[%s1315_s17 + $0x70] sm:$0x3]  ;;  %s1965_s16 = scalar_lea.vmem %s2005_s3, %s1178_s11 }
  0x15   : > { %v247_v8 = vrot.slane %v1327_v6, 1  ;;  %v249_v9 = vrot.slane %v185_v7, 1  ;;  %v1332_v10 = vld [vmem:[%s1315_s17 + $0x60] sm:$0xff]  ;;  %v288_v14 = vrot.slane %v1327_v6, 2  ;;  %v267_v15 = vrot.slane %v1322_v2, 2  ;;  %v1368_v26 = vld [vmem:[%s1315_s17 + $0x78] sm:$0xff] }
  0x16   : > { %v230_v11 = vsel %vm225_vm0, %v227_v3, %v229_v4  ;;  %v228_v12 = vsel %vm225_vm0, %v226_v5, %v227_v3  ;;  %v246_v13 = vrot.slane %v1332_v10, 1  ;;  %v287_v18 = vrot.slane %v1332_v10, 2  ;;  %v1371_v27 = vld [vmem:[%s1315_s17 + $0x18] sm:$0xff]  ;;  %v1374_v28 = vld [vmem:[%s1315_s17 + $0x80] sm:$0xff]  ;;  %v188_v36 = vld [vmem:[%s1315_s17 + $0x88] sm:$0x3] }
  0x17   : > { %335 = vrot.lane.b32.xlu1 %v230_v11, %s1273_s18  ;;  %333 = vrot.lane.b32.xlu0 %v228_v12, %s1273_s18  ;;  %v1342_v16 = vsel %vm225_vm0, %v247_v8, %v249_v9  ;;  %v268_v19 = vrot.slane %v1318_v0, 2  ;;  %v290_v22 = vrot.slane %v185_v7, 2  ;;  %v270_v23 = vrot.slane %v173_v1, 2  ;;  %v1377_v29 = vld [vmem:[%s1315_s17 + $0x20] sm:$0xff]  ;;  %v176_v37 = vld [vmem:[%s1315_s17 + $0x28] sm:$0x3] }
  0x18   : > { %v1345_v17 = vsel %vm225_vm0, %v246_v13, %v247_v8  ;;  %v1354_v20 = vsel %vm266_vm1, %v287_v18, %v288_v14  ;;  %v251_v30 = vrot.slane %v1368_v26, 1  ;;  %v252_v31 = vrot.slane %v1374_v28, 1  ;;  %v1435_v52 = vld [vmem:[%s1315_s17 + $0x90] sm:$0xff]  ;;  %v1448_v54 = vld [vmem:[%s1315_s17 + $0x98] sm:$0xff]  ;;  %v191_v62 = vld [vmem:[%s1315_s17 + $0xa0] sm:$0x3] }
  0x19   : > { %v269_v21 = vsel %vm266_vm1, %v267_v15, %v268_v19  ;;  %v1361_v24 = vsel %vm266_vm1, %v288_v14, %v290_v22  ;;  %v271_v25 = vsel %vm266_vm1, %v268_v19, %v270_v23  ;;  %v231_v32 = vrot.slane %v1371_v27, 1  ;;  %v1438_v53 = vld [vmem:[%s1315_s17 + $0x30] sm:$0xff]  ;;  %v1451_v55 = vld [vmem:[%s1315_s17 + $0x38] sm:$0xff]  ;;  %v179_v63 = vld [vmem:[%s1315_s17 + $0x40] sm:$0x3] }
  0x1a   : > { %v232_v33 = vrot.slane %v1377_v29, 1  ;;  %v1392_v34 = vsel %vm225_vm0, %v251_v30, %v252_v31  ;;  %v254_v38 = vrot.slane %v188_v36, 1  ;;  %v234_v39 = vrot.slane %v176_v37, 1  ;;  %2019 = vst [vmem:[#allocation6_spill] sm:$0xff] %v1451_v55  ;;  %v853_v8 = vld [vmem:[%s2003_s1] sm:$0xff]  ;;  %v854_v9 = vld [vmem:[%s2003_s1 + $0x8] sm:$0xff] }
  0x1b   : > { %351 = vrot.lane.b32.xlu1 %v1342_v16, %s1273_s18  ;;  %349 = vrot.lane.b32.xlu0 %v1345_v17, %s1273_s18  ;;  %2015 = vst [vmem:[#allocation2_spill] sm:$0xff] %v1392_v34  ;;  %v292_v40 = vrot.slane %v1368_v26, 2  ;;  %v293_v41 = vrot.slane %v1374_v28, 2  ;;  %v272_v44 = vrot.slane %v1371_v27, 2  ;;  %v273_v45 = vrot.slane %v1377_v29, 2  ;;  %v855_v15 = vld [vmem:[%s2003_s1 + $0x10] sm:$0xff] }
  0x1c   : > { %v233_v35 = vsel %vm225_vm0, %v231_v32, %v232_v33  ;;  %v1406_v42 = vsel %vm225_vm0, %v252_v31, %v254_v38  ;;  %v235_v43 = vsel %vm225_vm0, %v232_v33, %v234_v39  ;;  %v295_v48 = vrot.slane %v188_v36, 2  ;;  %v856_v18 = vld [vmem:[%s2003_s1 + $0x18] sm:$0xff]  ;;  %v857_v23 = vld [vmem:[%s2003_s1 + $0x20] sm:$0xf]  ;;  %v1521_v33 = vld [vmem:[%s1315_s17 + $0xa8] sm:$0xff] }
  0x1d   : > { %2016 = vst [vmem:[#allocation3_spill] sm:$0xff] %v1406_v42  ;;  %v1415_v46 = vsel %vm266_vm1, %v292_v40, %v293_v41  ;;  %v274_v47 = vsel %vm266_vm1, %v272_v44, %v273_v45  ;;  %v275_v49 = vrot.slane %v176_v37, 2  ;;  %v256_v56 = vrot.slane %v1435_v52, 1  ;;  %2020 = vst [vmem:[#allocation7_spill] sm:$0xff] %v1521_v33  ;;  %v1548_v44 = vld [vmem:[%s1315_s17 + $0x50] sm:$0xff] }
  0x1e   : > { %2017 = vst [vmem:[#allocation4_spill] sm:$0xff] %v1415_v46  ;;  %v1428_v50 = vsel %vm266_vm1, %v293_v41, %v295_v48  ;;  %v257_v57 = vrot.slane %v1448_v54, 1  ;;  %v236_v58 = vrot.slane %v1438_v53, 1  ;;  %v237_v59 = vrot.slane %v1451_v55, 1  ;;  %2023 = vst [vmem:[#allocation10_spill] sm:$0xff] %v1548_v44 }
  0x1f   : > { %397 = vrot.lane.b32.xlu1 %v1354_v20, %s1274_s19  ;;  %381 = vrot.lane.b32.xlu0 %v269_v21, %s1274_s19  ;;  %2018 = vst [vmem:[#allocation5_spill] sm:$0xff] %v1428_v50  ;;  %v276_v51 = vsel %vm266_vm1, %v273_v45, %v275_v49  ;;  %v259_v1 = vrot.slane %v191_v62, 1  ;;  %v239_v3 = vrot.slane %v179_v63, 1  ;;  %v297_v4 = vrot.slane %v1435_v52, 2 }
  0x20   : > { %v258_v60 = vsel %vm225_vm0, %v256_v56, %v257_v57  ;;  %v238_v61 = vsel %vm225_vm0, %v236_v58, %v237_v59  ;;  %v298_v5 = vrot.slane %v1448_v54, 2  ;;  %v277_v7 = vrot.slane %v1438_v53, 2 }
  0x21   : > { %v260_v11 = vsel %vm225_vm0, %v257_v57, %v259_v1  ;;  %v240_v12 = vsel %vm225_vm0, %v237_v59, %v239_v3  ;;  %v278_v13 = vrot.slane %v1451_v55, 2  ;;  %v1234_v14 = vpack.c.bf16 %v854_v9, %v853_v8 }
  0x22   : > { %v299_v19 = vsel %vm266_vm1, %v297_v4, %v298_v5  ;;  %v1238_v22 = vpack.c.bf16 %v856_v18, %v855_v15  ;;  %v280_v30 = vrot.slane %v179_v63, 2  ;;  %v261_v45 = vrot.slane %v1521_v33, 1 }
  0x23   : > { %399 = vrot.lane.b32.xlu1 %v1361_v24, %s1274_s19  ;;  %383 = vrot.lane.b32.xlu0 %v271_v25, %s1274_s19  ;;  %v279_v21 = vsel %vm266_vm1, %v277_v7, %v278_v13  ;;  %v300_v25 = vrot.slane %v191_v62, 2  ;;  %v242_v49 = vrot.slane %v1548_v44, 1  ;;  %v182_v62 = vld [vmem:[%s1315_s17 + $0x58] sm:$0x3] }
  0x24   : > { %1235 = vmatprep.subr.bf16.mxu0 %v1234_v14  ;;  %1242 = vmatprep.subr.bf16.mxu1 %v1234_v14  ;;  %v281_v32 = vsel %vm266_vm1, %v278_v13, %v280_v30  ;;  %v244_v4 = vrot.slane %v182_v62, 1 }
  0x25   : > { %1237 = vmatpush3.bf16.msra.mxu0 %v1234_v14  ;;  %1245 = vmatpush3.bf16.msra.mxu1 %v1234_v14  ;;  %v301_v31 = vsel %vm266_vm1, %v298_v5, %v300_v25  ;;  %v283_v14 = vrot.slane %v1548_v44, 2 }
  0x26   : > { %1239 = vmatprep.subr.bf16.mxu0 %v1238_v22  ;;  %1243 = vmatprep.subr.bf16.mxu1 %v1238_v22  ;;  %v245_v9 = vsel %vm225_vm0, %v242_v49, %v244_v4 }
  0x27   : > { %445 = vrot.lane.b32.xlu1 %v1368_v26, %s1275_s20  ;;  %429 = vrot.lane.b32.xlu0 %v1371_v27, %s1275_s20 }
  0x29   : > { %1241 = vmatpush3.bf16.msra.mxu0 %v1238_v22  ;;  %1246 = vmatpush3.bf16.msra.mxu1 %v1238_v22 }
  0x2a   : > { %1208 = vmatprep.subr.msk.mxu0 %vm914_vm2, %v857_v23  ;;  %1244 = vmatprep.subr.msk.mxu1 %vm914_vm2, %v857_v23 }
  0x2b   : > { %447 = vrot.lane.b32.xlu1 %v1374_v28, %s1275_s20  ;;  %431 = vrot.lane.b32.xlu0 %v1377_v29, %s1275_s20 }
  0x2d   : > { %1209 = vmatpush3.msk.msra.mxu0 %vm914_vm2, %v857_v23  ;;  %1247 = vmatpush3.msk.msra.mxu1 %vm914_vm2, %v857_v23 }
  0x2f   : > { %493 = vrot.lane.b32.xlu1 %v1392_v34, %s1276_s21  ;;  %477 = vrot.lane.b32.xlu0 %v233_v35, %s1276_s21 }
  0x33   : > { %353 = vrot.lane.b32.xlu1 %v1392_v34, %s1273_s18  ;;  %337 = vrot.lane.b32.xlu0 %v233_v35, %s1273_s18  ;;  %v1524_v35 = vld [vmem:[%s1315_s17 + $0x48] sm:$0xff] }
  0x34   : > { %2021 = vst [vmem:[#allocation8_spill] sm:$0xff] %v1524_v35  ;;  %v241_v48 = vrot.slane %v1524_v35, 1  ;;  %v282_v13 = vrot.slane %v1524_v35, 2 }
  0x36   : > { %v243_v58 = vsel %vm225_vm0, %v241_v48, %v242_v49 }
  0x37   : > { %495 = vrot.lane.b32.xlu1 %v1406_v42, %s1276_s21  ;;  %479 = vrot.lane.b32.xlu0 %v235_v43, %s1276_s21 }
  0x3b   : > { %541 = vrot.lane.b32.xlu1 %v1415_v46, %s1277_s22  ;;  %525 = vrot.lane.b32.xlu0 %v274_v47, %s1277_s22 }
  0x3f   : > { %355 = vrot.lane.b32.xlu1 %v1406_v42, %s1273_s18  ;;  %339 = vrot.lane.b32.xlu0 %v235_v43, %s1273_s18  ;;  %v1545_v43 = vld [vmem:[%s1315_s17 + $0xb0] sm:$0xff] }
  0x40   : > { %2022 = vst [vmem:[#allocation9_spill] sm:$0xff] %v1545_v43 }
  0x43   : > { %401 = vrot.lane.b32.xlu1 %v1415_v46, %s1274_s19  ;;  %385 = vrot.lane.b32.xlu0 %v274_v47, %s1274_s19  ;;  %v262_v47 = vrot.slane %v1545_v43, 1 }
  0x45   : > { %v263_v57 = vsel %vm225_vm0, %v261_v45, %v262_v47 }
  0x47   : > { %543 = vrot.lane.b32.xlu1 %v1428_v50, %s1277_s22  ;;  %527 = vrot.lane.b32.xlu0 %v276_v51, %s1277_s22 }
  0x4b   : > { %589 = vrot.lane.b32.xlu1 %v1435_v52, %s1278_s23  ;;  %573 = vrot.lane.b32.xlu0 %v1438_v53, %s1278_s23 }
  0x4f   : > { %403 = vrot.lane.b32.xlu1 %v1428_v50, %s1274_s19  ;;  %387 = vrot.lane.b32.xlu0 %v276_v51, %s1274_s19 }
  0x53   : > { %449 = vrot.lane.b32.xlu1 %v1435_v52, %s1275_s20  ;;  %433 = vrot.lane.b32.xlu0 %v1438_v53, %s1275_s20 }
  0x57   : > { %591 = vrot.lane.b32.xlu1 %v1448_v54, %s1278_s23  ;;  %575 = vrot.lane.b32.xlu0 %v1451_v55, %s1278_s23 }
  0x5b   : > { %637 = vrot.lane.b32.xlu1 %v258_v60, %s1279_s24  ;;  %621 = vrot.lane.b32.xlu0 %v238_v61, %s1279_s24 }
  0x5f   : > { %451 = vrot.lane.b32.xlu1 %v1448_v54, %s1275_s20  ;;  %435 = vrot.lane.b32.xlu0 %v1451_v55, %s1275_s20 }
  0x63   : > { %497 = vrot.lane.b32.xlu1 %v258_v60, %s1276_s21  ;;  %481 = vrot.lane.b32.xlu0 %v238_v61, %s1276_s21 }
  0x67   : > { %639 = vrot.lane.b32.xlu1 %v260_v11, %s1279_s24  ;;  %623 = vrot.lane.b32.xlu0 %v240_v12, %s1279_s24 }
  0x6b   : > { %685 = vrot.lane.b32.xlu1 %v299_v19, %s1280_s6  ;;  %669 = vrot.lane.b32.xlu0 %v279_v21, %s1280_s6 }
  0x6f   : > { %357 = vrot.lane.b32.xlu1 %v258_v60, %s1273_s18  ;;  %341 = vrot.lane.b32.xlu0 %v238_v61, %s1273_s18  ;;  %v194_v61 = vld [vmem:[%s1315_s17 + $0xb8] sm:$0x3] }
  0x70   : > { %v264_v3 = vrot.slane %v194_v61, 1  ;;  %v305_v45 = vrot.slane %v194_v61, 2 }
  0x72   : > { %v265_v8 = vsel %vm225_vm0, %v262_v47, %v264_v3  ;;  %v285_v47 = vrot.slane %v182_v62, 2 }
  0x73   : > { %499 = vrot.lane.b32.xlu1 %v260_v11, %s1276_s21  ;;  %483 = vrot.lane.b32.xlu0 %v240_v12, %s1276_s21 }
  0x77   : > { %545 = vrot.lane.b32.xlu1 %v299_v19, %s1277_s22  ;;  %529 = vrot.lane.b32.xlu0 %v279_v21, %s1277_s22 }
  0x7b   : > { %687 = vrot.lane.b32.xlu1 %v301_v31, %s1280_s6  ;;  %671 = vrot.lane.b32.xlu0 %v281_v32, %s1280_s6 }
  0x7f   : > { %359 = vrot.lane.b32.xlu1 %v260_v11, %s1273_s18  ;;  %343 = vrot.lane.b32.xlu0 %v240_v12, %s1273_s18  ;;  %v302_v11 = vrot.slane %v1521_v33, 2  ;;  %v303_v12 = vrot.slane %v1545_v43, 2 }
  0x83   : > { %405 = vrot.lane.b32.xlu1 %v299_v19, %s1274_s19  ;;  %389 = vrot.lane.b32.xlu0 %v279_v21, %s1274_s19  ;;  %v304_v19 = vsel %vm266_vm1, %v302_v11, %v303_v12  ;;  %v284_v21 = vsel %vm266_vm1, %v282_v13, %v283_v14 }
  0x87   : > { %547 = vrot.lane.b32.xlu1 %v301_v31, %s1277_s22  ;;  %531 = vrot.lane.b32.xlu0 %v281_v32, %s1277_s22 }
  0x89   : > { %v1526_v36 = vpop.permute.xlu1 %335  ;;  %v1528_v37 = vpop.permute.xlu0 %333 }
  0x8b   : > { %593 = vrot.lane.b32.xlu1 %v1521_v33, %s1278_s23  ;;  %577 = vrot.lane.b32.xlu0 %v1524_v35, %s1278_s23 }
  0x8d   : > { %v1534_v38 = vpop.permute.xlu1 %351  ;;  %v1536_v39 = vpop.permute.xlu0 %349 }
  0x8f   : > { %407 = vrot.lane.b32.xlu1 %v301_v31, %s1274_s19  ;;  %391 = vrot.lane.b32.xlu0 %v281_v32, %s1274_s19 }
  0x91   : > { %v1540_v40 = vpop.permute.xlu1 %397  ;;  %v1542_v41 = vpop.permute.xlu0 %381 }
  0x93   : > { %453 = vrot.lane.b32.xlu1 %v1521_v33, %s1275_s20  ;;  %437 = vrot.lane.b32.xlu0 %v1524_v35, %s1275_s20 }
  0x95   : > { %v1558_v51 = vpop.permute.xlu1 %399  ;;  %v1560_v56 = vpop.permute.xlu0 %383 }
  0x97   : > { %595 = vrot.lane.b32.xlu1 %v1545_v43, %s1278_s23  ;;  %579 = vrot.lane.b32.xlu0 %v1548_v44, %s1278_s23 }
  0x99   : > { %v1568_v59 = vpop.permute.xlu1 %445  ;;  %v1570_v60 = vpop.permute.xlu0 %429 }
  0x9b   : > { %641 = vrot.lane.b32.xlu1 %v263_v57, %s1279_s24  ;;  %625 = vrot.lane.b32.xlu0 %v243_v58, %s1279_s24 }
  0x9d   : > { %v1576_v63 = vpop.permute.xlu1 %447  ;;  %v1578_v1 = vpop.permute.xlu0 %431 }
  0x9f   : > { %455 = vrot.lane.b32.xlu1 %v1545_v43, %s1275_s20  ;;  %439 = vrot.lane.b32.xlu0 %v1548_v44, %s1275_s20  ;;  %v1660_v43 = vld [vmem:[%s1315_s17 + $0xc8] sm:$0xff] }
  0xa0   : > { %v311_v46 = vrot.slane %v1660_v43, 1 }
  0xa1   : > { %v1584_v5 = vpop.permute.xlu1 %493  ;;  %v1586_v7 = vpop.permute.xlu0 %477 }
  0xa3   : > { %501 = vrot.lane.b32.xlu1 %v263_v57, %s1276_s21  ;;  %485 = vrot.lane.b32.xlu0 %v243_v58, %s1276_s21 }
  0xa5   : > { %v354_v15 = vpop.permute.xlu1 %353  ;;  %v338_v18 = vpop.permute.xlu0 %337 }
  0xa6   : > { %v728_v35 = vsel %vm717_vm3, %v1368_v26, %v354_v15  ;;  %v720_v33 = vsel %vm717_vm3, %v1371_v27, %v338_v18 }
  0xa7   : > { %643 = vrot.lane.b32.xlu1 %v265_v8, %s1279_s24  ;;  %627 = vrot.lane.b32.xlu0 %v245_v9, %s1279_s24 }
  0xa9   : > { %v1600_v22 = vpop.permute.xlu1 %495  ;;  %v1602_v23 = vpop.permute.xlu0 %479 }
  0xab   : > { %689 = vrot.lane.b32.xlu1 %v304_v19, %s1280_s6  ;;  %673 = vrot.lane.b32.xlu0 %v284_v21, %s1280_s6 }
  0xad   : > { %v1606_v25 = vpop.permute.xlu1 %541  ;;  %v1608_v30 = vpop.permute.xlu0 %525 }
  0xaf   : > { %361 = vrot.lane.b32.xlu1 %v263_v57, %s1273_s18  ;;  %345 = vrot.lane.b32.xlu0 %v243_v58, %s1273_s18  ;;  %v306_v57 = vsel %vm266_vm1, %v303_v12, %v305_v45  ;;  %v286_v58 = vsel %vm266_vm1, %v283_v14, %v285_v47  ;;  %v1643_v45 = vld [vmem:[%s1315_s17 + $0xc0] sm:$0xff] }
  0xb0   : > { %v310_v50 = vrot.slane %v1643_v45, 1 }
  0xb1   : > { %v1612_v31 = vpop.permute.xlu1 %355  ;;  %v1614_v32 = vpop.permute.xlu0 %339 }
  0xb3   : > { %503 = vrot.lane.b32.xlu1 %v265_v8, %s1276_s21  ;;  %487 = vrot.lane.b32.xlu0 %v245_v9, %s1276_s21 }
  0xb5   : > { %v402_v48 = vpop.permute.xlu1 %401  ;;  %v386_v49 = vpop.permute.xlu0 %385 }
  0xb7   : > { %549 = vrot.lane.b32.xlu1 %v304_v19, %s1277_s22  ;;  %533 = vrot.lane.b32.xlu0 %v284_v21, %s1277_s22 }
  0xb9   : > { %v1622_v3 = vpop.permute.xlu1 %543  ;;  %v1624_v4 = vpop.permute.xlu0 %527 }
  0xbb   : > { %691 = vrot.lane.b32.xlu1 %v306_v57, %s1280_s6  ;;  %675 = vrot.lane.b32.xlu0 %v286_v58, %s1280_s6 }
  0xbd   : > { %v1628_v61 = vpop.permute.xlu1 %589  ;;  %v1630_v62 = vpop.permute.xlu0 %573 }
  0xbf   : > { %363 = vrot.lane.b32.xlu1 %v265_v8, %s1273_s18  ;;  %347 = vrot.lane.b32.xlu0 %v245_v9, %s1273_s18 }
  0xc1   : > { %v1634_v11 = vpop.permute.xlu1 %403  ;;  %v1636_v12 = vpop.permute.xlu0 %387 }
  0xc3   : > { %409 = vrot.lane.b32.xlu1 %v304_v19, %s1274_s19  ;;  %393 = vrot.lane.b32.xlu0 %v284_v21, %s1274_s19 }
  0xc5   : > { %v450_v13 = vpop.permute.xlu1 %449  ;;  %v434_v14 = vpop.permute.xlu0 %433 }
  0xc7   : > { %551 = vrot.lane.b32.xlu1 %v306_v57, %s1277_s22  ;;  %535 = vrot.lane.b32.xlu0 %v286_v58, %s1277_s22 }
  0xc9   : > { %v1645_v8 = vpop.permute.xlu1 %591  ;;  %v1647_v9 = vpop.permute.xlu0 %575 }
  0xcb   : > { %597 = vrot.lane.b32.xlu1 %v1643_v45, %s1278_s23  ;;  %581 = vrot.lane.b32.xlu0 %v1332_v10, %s1278_s23 }
  0xcd   : > { %v638_v19 = vpop.permute.xlu1 %637  ;;  %v622_v21 = vpop.permute.xlu0 %621 }
  0xcf   : > { %411 = vrot.lane.b32.xlu1 %v306_v57, %s1274_s19  ;;  %395 = vrot.lane.b32.xlu0 %v286_v58, %s1274_s19  ;;  %v745_v57 = vsel %vm734_vm4, %v728_v35, %v402_v48  ;;  %v737_v58 = vsel %vm734_vm4, %v720_v33, %v386_v49  ;;  %v718_v33 = vsel %vm717_vm3, %v1322_v2, %v1528_v37 }
  0xd0   : > { %v762_v15 = vsel %vm751_vm5, %v745_v57, %v450_v13  ;;  %v754_v42 = vsel %vm751_vm5, %v737_v58, %v434_v14  ;;  %v726_v35 = vsel %vm717_vm3, %v1332_v10, %v1536_v39  ;;  %v312_v49 = vsel %vm225_vm0, %v310_v50, %v311_v46 }
  0xd1   : > { %v1655_v47 = vpop.permute.xlu1 %451  ;;  %v1657_v44 = vpop.permute.xlu0 %435  ;;  %v743_v48 = vsel %vm734_vm4, %v726_v35, %v1540_v40  ;;  %v316_v35 = vrot.slane %v1660_v43, 2 }
  0xd2   : > { %v760_v2 = vsel %vm751_vm5, %v743_v48, %v1568_v59 }
  0xd3   : > { %457 = vrot.lane.b32.xlu1 %v1643_v45, %s1275_s20  ;;  %441 = vrot.lane.b32.xlu0 %v1332_v10, %s1275_s20  ;;  %v777_v13 = vsel %vm768_vm6, %v760_v2, %v1584_v5 }
  0xd4   : > { %v794_v50 = vsel %vm785_vm7, %v777_v13, %v1606_v25 }
  0xd5   : > { %v498_v27 = vpop.permute.xlu1 %497  ;;  %v482_v18 = vpop.permute.xlu0 %481  ;;  %v811_v59 = vsel %vm802_vm8, %v794_v50, %v1628_v61 }
  0xd6   : > { %v1677_v34 = vsel %vm768_vm6, %v762_v15, %v498_v27  ;;  %v1680_v55 = vsel %vm768_vm6, %v754_v42, %v482_v18  ;;  %v735_v42 = vsel %vm734_vm4, %v718_v33, %v1542_v41  ;;  %v828_v5 = vsel %vm819_vm9, %v811_v59, %v638_v19 }
  0xd7   : > { %599 = vrot.lane.b32.xlu1 %v1660_v43, %s1278_s23  ;;  %583 = vrot.lane.b32.xlu0 %v1327_v6, %s1278_s23  ;;  %v752_v10 = vsel %vm751_vm5, %v735_v42, %v1570_v60  ;;  %v721_v15 = vsel %vm717_vm3, %v1377_v29, %v1614_v32  ;;  %v315_v27 = vrot.slane %v1643_v45, 2 }
  0xd8   : > { %v769_v40 = vsel %vm768_vm6, %v752_v10, %v1586_v7  ;;  %v738_v33 = vsel %vm734_vm4, %v721_v15, %v1636_v12 }
  0xd9   : > { %v640_v37 = vpop.permute.xlu1 %639  ;;  %v624_v39 = vpop.permute.xlu0 %623  ;;  %v786_v41 = vsel %vm785_vm7, %v769_v40, %v1608_v30  ;;  %v197_v30 = vld [vmem:[%s1315_s17 + $0xd0] sm:$0x3]  ;;  %v755_v32 = vsel %vm751_vm5, %v738_v33, %v1657_v44 }
  0xda   : > { %v803_v60 = vsel %vm802_vm8, %v786_v41, %v1630_v62  ;;  %v313_v61 = vrot.slane %v197_v30, 1 }
  0xdb   : > { %645 = vrot.lane.b32.xlu1 %v312_v49, %s1279_s24  ;;  %629 = vrot.lane.b32.xlu0 %v1345_v17, %s1279_s24  ;;  %v820_v7 = vsel %vm819_vm9, %v803_v60, %v622_v21  ;;  %v729_v21 = vsel %vm717_vm3, %v1374_v28, %v1612_v31 }
  0xdc   : > { %v746_v18 = vsel %vm734_vm4, %v729_v21, %v1634_v11  ;;  %v314_v31 = vsel %vm225_vm0, %v311_v46, %v313_v61  ;;  %v727_v46 = vsel %vm717_vm3, %v1327_v6, %v1534_v38 }
  0xdd   : > { %v686_v25 = vpop.permute.xlu1 %685  ;;  %v670_v14 = vpop.permute.xlu0 %669  ;;  %v763_v29 = vsel %vm751_vm5, %v746_v18, %v1655_v47  ;;  %v317_v47 = vsel %vm266_vm1, %v315_v27, %v316_v35 }
  0xde   : > { %v845_v57 = vsel %vm836_vm10, %v828_v5, %v686_v25  ;;  %v837_v58 = vsel %vm836_vm10, %v820_v7, %v670_v14  ;;  %v199_v7 = vld [vmem:[%s1315_s17 + $0xe0] sm:$0xff] }
  0xdf   : > { %459 = vrot.lane.b32.xlu1 %v1660_v43, %s1275_s20  ;;  %1222 = vmatprep.mubr.msk.f32.mxu1 %vm865_vm11, %v845_v57  ;;  %v744_v43 = vsel %vm734_vm4, %v727_v46, %v1558_v51  ;;  %v324_v14 = vrot.slane %v199_v7, 1  ;;  %v2024_v57 = vld [vmem:[#allocation6_spill] sm:$0xff] }
  0xe0   : > { %443 = vrot.lane.b32.xlu0 %v1327_v6, %s1275_s20  ;;  %1210 = vmatprep.mubr.msk.f32.mxu0 %vm865_vm11, %v837_v58 }
  0xe1   : > { %v358_v62 = vpop.permute.xlu1 %357  ;;  %v342_v19 = vpop.permute.xlu0 %341 }
  0xe2   : > { %v730_v13 = vsel %vm717_vm3, %v1435_v52, %v358_v62  ;;  %v198_v52 = vld [vmem:[%s1315_s17 + $0xd8] sm:$0xff] }
  0xe3   : > { %505 = vrot.lane.b32.xlu1 %v312_v49, %s1276_s21  ;;  %v323_v25 = vrot.slane %v198_v52, 1 }
  0xe4   : > { %489 = vrot.lane.b32.xlu0 %v1345_v17, %s1276_s21  ;;  %v719_v17 = vsel %vm717_vm3, %v1318_v0, %v1526_v36  ;;  %v761_v0 = vsel %vm751_vm5, %v744_v43, %v1576_v63 }
  0xe5   : > { %v500_v45 = vpop.permute.xlu1 %499  ;;  %v484_v48 = vpop.permute.xlu0 %483  ;;  %v736_v44 = vsel %vm734_vm4, %v719_v17, %v1560_v56  ;;  %v778_v51 = vsel %vm768_vm6, %v761_v0, %v1600_v22 }
  0xe6   : > { %v1748_v11 = vsel %vm768_vm6, %v763_v29, %v500_v45  ;;  %v1751_v12 = vsel %vm768_vm6, %v755_v32, %v484_v48  ;;  %v753_v36 = vsel %vm751_vm5, %v736_v44, %v1578_v1  ;;  %v795_v42 = vsel %vm785_vm7, %v778_v51, %v1622_v3  ;;  %v2025_v29 = vld [vmem:[#allocation2_spill] sm:$0xff]  ;;  %v2026_v48 = vld [vmem:[#allocation3_spill] sm:$0xff] }
  0xe7   : > { %647 = vrot.lane.b32.xlu1 %v314_v31, %s1279_s24  ;;  %v770_v56 = vsel %vm768_vm6, %v753_v36, %v1602_v23  ;;  %v812_v63 = vsel %vm802_vm8, %v795_v42, %v1645_v8  ;;  %v318_v8 = vrot.slane %v197_v30, 2 }
  0xe8   : > { %631 = vrot.lane.b32.xlu0 %v1342_v16, %s1279_s24  ;;  %v787_v49 = vsel %vm785_vm7, %v770_v56, %v1624_v4  ;;  %v829_v22 = vsel %vm819_vm9, %v812_v63, %v640_v37 }
  0xe9   : > { %v1771_v6 = vpop.permute.xlu1 %545  ;;  %v1773_v38 = vpop.permute.xlu0 %529  ;;  %v804_v1 = vsel %vm802_vm8, %v787_v49, %v1647_v9  ;;  %v2028_v49 = vld [vmem:[#allocation5_spill] sm:$0xff] }
  0xea   : > { %v821_v23 = vsel %vm819_vm9, %v804_v1, %v624_v39  ;;  %v319_v39 = vsel %vm266_vm1, %v316_v35, %v318_v8  ;;  %v328_v35 = vrot.slane %v198_v52, 2 }
  0xeb   : > { %693 = vrot.lane.b32.xlu1 %v317_v47, %s1280_s6 }
  0xec   : > { %677 = vrot.lane.b32.xlu0 %v1354_v20, %s1280_s6 }
  0xed   : > { %v688_v2 = vpop.permute.xlu1 %687  ;;  %v672_v3 = vpop.permute.xlu0 %671 }
  0xee   : > { %v846_v10 = vsel %vm836_vm10, %v829_v22, %v688_v2  ;;  %v838_v4 = vsel %vm836_vm10, %v821_v23, %v672_v3 }
  0xef   : > { %507 = vrot.lane.b32.xlu1 %v314_v31, %s1276_s21  ;;  %1223 = vmatmul.mubr.msk.f32.vlgmr.msra.gmra.mrb[0].mxu1 %vm865_vm11, %v846_v10  ;;  %v329_v31 = vrot.slane %v199_v7, 2  ;;  %v796_v10 = vsel %vm785_vm7, %v1677_v34, %v1771_v6 }
  0xf0   : > { %491 = vrot.lane.b32.xlu0 %v1342_v16, %s1276_s21  ;;  %1211 = vmatmul.mubr.msk.f32.vlgmr.msra.gmra.mrb[0].mxu0 %vm865_vm11, %v838_v4  ;;  %v722_v16 = vsel %vm717_vm3, %v1438_v53, %v342_v19  ;;  %v788_v4 = vsel %vm785_vm7, %v1680_v55, %v1773_v38 }
  0xf1   : > { %v360_v9 = vpop.permute.xlu1 %359  ;;  %v344_v37 = vpop.permute.xlu0 %343  ;;  %v330_v17 = vsel %vm266_vm1, %v328_v35, %v329_v31 }
  0xf2   : > { %v731_v30 = vsel %vm717_vm3, %v1448_v54, %v360_v9  ;;  %v723_v58 = vsel %vm717_vm3, %v2024_v57, %v344_v37 }
  0xf3   : > { %553 = vrot.lane.b32.xlu1 %v317_v47, %s1277_s22  ;;  %v2027_v47 = vld [vmem:[#allocation4_spill] sm:$0xff] }
  0xf4   : > { %537 = vrot.lane.b32.xlu0 %v1354_v20, %s1277_s22 }
  0xf5   : > { %v406_v40 = vpop.permute.xlu1 %405  ;;  %v390_v50 = vpop.permute.xlu0 %389 }
  0xf6   : > { %v747_v41 = vsel %vm734_vm4, %v730_v13, %v406_v40  ;;  %v739_v59 = vsel %vm734_vm4, %v722_v16, %v390_v50 }
  0xf7   : > { %695 = vrot.lane.b32.xlu1 %v319_v39, %s1280_s6 }
  0xf8   : > { %679 = vrot.lane.b32.xlu0 %v1361_v24, %s1280_s6 }
  0xf9   : > { %v1812_v20 = vpop.permute.xlu1 %547  ;;  %v1814_v60 = vpop.permute.xlu0 %531 }
  0xfb   : > { %555 = vrot.lane.b32.xlu1 %v319_v39, %s1277_s22 }
  0xfc   : > { %539 = vrot.lane.b32.xlu0 %v1361_v24, %s1277_s22  ;;  %v200_v24 = vld [vmem:[%s1315_s17 + $0xe8] sm:$0x3] }
  0xfd   : > { %v594_v53 = vpop.permute.xlu1 %593  ;;  %v578_v5 = vpop.permute.xlu0 %577  ;;  %v326_v15 = vrot.slane %v200_v24, 1  ;;  %v331_v46 = vrot.slane %v200_v24, 2 }
  0xfe   : > { %v813_v8 = vsel %vm802_vm8, %v796_v10, %v594_v53  ;;  %v805_v9 = vsel %vm802_vm8, %v788_v4, %v578_v5  ;;  %v797_v5 = vsel %vm785_vm7, %v1748_v11, %v1812_v20  ;;  %v2029_v20 = vld [vmem:[#allocation7_spill] sm:$0xff] }
  0xff   : > { %601 = vrot.lane.b32.xlu1 %v198_v52, %s1278_s23  ;;  %v327_v32 = vsel %vm225_vm0, %v324_v14, %v326_v15  ;;  %v332_v0 = vsel %vm266_vm1, %v329_v31, %v331_v46 }
 0x100   : > { %585 = vrot.lane.b32.xlu0 %v1368_v26, %s1278_s23  ;;  %v325_v26 = vsel %vm225_vm0, %v323_v25, %v324_v14 }
 0x101   : > { %v408_v61 = vpop.permute.xlu1 %407  ;;  %v392_v62 = vpop.permute.xlu0 %391 }
 0x102   : > { %v748_v19 = vsel %vm734_vm4, %v731_v30, %v408_v61  ;;  %v740_v21 = vsel %vm734_vm4, %v723_v58, %v392_v62 }
 0x103   : > { %603 = vrot.lane.b32.xlu1 %v199_v7, %s1278_s23  ;;  %v789_v7 = vsel %vm785_vm7, %v1751_v12, %v1814_v60 }
 0x104   : > { %587 = vrot.lane.b32.xlu0 %v1374_v28, %s1278_s23 }
 0x105   : > { %v454_v27 = vpop.permute.xlu1 %453  ;;  %v438_v54 = vpop.permute.xlu0 %437 }
 0x106   : > { %v764_v18 = vsel %vm751_vm5, %v747_v41, %v454_v27  ;;  %v756_v33 = vsel %vm751_vm5, %v739_v59, %v438_v54 }
 0x107   : > { %649 = vrot.lane.b32.xlu1 %v325_v26, %s1279_s24 }
 0x108   : > { %633 = vrot.lane.b32.xlu0 %v2025_v29, %s1279_s24 }
 0x109   : > { %v596_v45 = vpop.permute.xlu1 %595  ;;  %v580_v28 = vpop.permute.xlu0 %579 }
 0x10a   : > { %v814_v25 = vsel %vm802_vm8, %v797_v5, %v596_v45  ;;  %v806_v14 = vsel %vm802_vm8, %v789_v7, %v580_v28 }
 0x10b   : > { %651 = vrot.lane.b32.xlu1 %v327_v32, %s1279_s24 }
 0x10c   : > { %635 = vrot.lane.b32.xlu0 %v2026_v48, %s1279_s24 }
 0x10d   : > { %v642_v43 = vpop.permute.xlu1 %641  ;;  %v626_v44 = vpop.permute.xlu0 %625 }
 0x10e   : > { %v830_v37 = vsel %vm819_vm9, %v813_v8, %v642_v43  ;;  %v822_v39 = vsel %vm819_vm9, %v805_v9, %v626_v44 }
 0x10f   : > { %697 = vrot.lane.b32.xlu1 %v330_v17, %s1280_s6 }
 0x110   : > { %681 = vrot.lane.b32.xlu0 %v2027_v47, %s1280_s6 }
 0x111   : > { %v456_v36 = vpop.permute.xlu1 %455  ;;  %v440_v51 = vpop.permute.xlu0 %439 }
 0x112   : > { %v765_v56 = vsel %vm751_vm5, %v748_v19, %v456_v36  ;;  %v757_v42 = vsel %vm751_vm5, %v740_v21, %v440_v51  ;;  %v2030_v19 = vld [vmem:[#allocation8_spill] sm:$0xff] }
 0x113   : > { %699 = vrot.lane.b32.xlu1 %v332_v0, %s1280_s6 }
 0x114   : > { %683 = vrot.lane.b32.xlu0 %v2028_v49, %s1280_s6 }
 0x115   : > { %v502_v63 = vpop.permute.xlu1 %501  ;;  %v486_v1 = vpop.permute.xlu0 %485 }
 0x116   : > { %v1855_v22 = vsel %vm768_vm6, %v764_v18, %v502_v63  ;;  %v1858_v23 = vsel %vm768_vm6, %v756_v33, %v486_v1 }
 0x119   : > { %v644_v2 = vpop.permute.xlu1 %643  ;;  %v628_v3 = vpop.permute.xlu0 %627 }
 0x11a   : > { %v831_v30 = vsel %vm819_vm9, %v814_v25, %v644_v2  ;;  %v823_v57 = vsel %vm819_vm9, %v806_v14, %v628_v3 }
 0x11d   : > { %v690_v13 = vpop.permute.xlu1 %689  ;;  %v674_v16 = vpop.permute.xlu0 %673 }
 0x11e   : > { %v847_v40 = vsel %vm836_vm10, %v830_v37, %v690_v13  ;;  %v839_v50 = vsel %vm836_vm10, %v822_v39, %v674_v16 }
 0x11f   : > { %1213 = vmatprep.mubr.msk.f32.mxu0 %vm865_vm11, %v839_v50  ;;  %1225 = vmatprep.mubr.msk.f32.mxu1 %vm865_vm11, %v847_v40 }
 0x121   : > { %v362_v34 = vpop.permute.xlu1 %361  ;;  %v346_v55 = vpop.permute.xlu0 %345 }
 0x122   : > { %v732_v60 = vsel %vm717_vm3, %v2029_v20, %v362_v34  ;;  %v724_v21 = vsel %vm717_vm3, %v2030_v19, %v346_v55 }
 0x125   : > { %v504_v6 = vpop.permute.xlu1 %503  ;;  %v488_v38 = vpop.permute.xlu0 %487 }
 0x126   : > { %v782_v41 = vsel %vm768_vm6, %v765_v56, %v504_v6  ;;  %v774_v59 = vsel %vm768_vm6, %v757_v42, %v488_v38 }
 0x129   : > { %v550_v52 = vpop.permute.xlu1 %549  ;;  %v534_v53 = vpop.permute.xlu0 %533 }
 0x12a   : > { %v798_v42 = vsel %vm785_vm7, %v1855_v22, %v550_v52  ;;  %v790_v49 = vsel %vm785_vm7, %v1858_v23, %v534_v53 }
 0x12d   : > { %v692_v58 = vpop.permute.xlu1 %691  ;;  %v676_v61 = vpop.permute.xlu0 %675 }
 0x12e   : > { %v848_v62 = vsel %vm836_vm10, %v831_v30, %v692_v58  ;;  %v840_v24 = vsel %vm836_vm10, %v823_v57, %v676_v61 }
 0x12f   : > { %1214 = vmatmul.mubr.msk.f32.gmra.mrb[2].mxu0 %vm865_vm11, %v840_v24  ;;  %1226 = vmatmul.mubr.msk.f32.gmra.mrb[2].mxu1 %vm865_vm11, %v848_v62 }
 0x131   : > { %v1890_v11 = vpop.permute.xlu1 %363  ;;  %v1892_v12 = vpop.permute.xlu0 %347 }
 0x135   : > { %v410_v26 = vpop.permute.xlu1 %409  ;;  %v394_v15 = vpop.permute.xlu0 %393 }
 0x136   : > { %v749_v27 = vsel %vm734_vm4, %v732_v60, %v410_v26  ;;  %v741_v54 = vsel %vm734_vm4, %v724_v21, %v394_v15  ;;  %v2031_v60 = vld [vmem:[#allocation9_spill] sm:$0xff]  ;;  %v2032_v15 = vld [vmem:[#allocation10_spill] sm:$0xff] }
 0x137   : > { %v733_v19 = vsel %vm717_vm3, %v2031_v60, %v1890_v11 }
 0x139   : > { %v552_v18 = vpop.permute.xlu1 %551  ;;  %v536_v33 = vpop.permute.xlu0 %535 }
 0x13a   : > { %v799_v13 = vsel %vm785_vm7, %v782_v41, %v552_v18  ;;  %v791_v16 = vsel %vm785_vm7, %v774_v59, %v536_v33  ;;  %v725_v18 = vsel %vm717_vm3, %v2032_v15, %v1892_v12 }
 0x13d   : > { %v598_v35 = vpop.permute.xlu1 %597  ;;  %v582_v31 = vpop.permute.xlu0 %581 }
 0x13e   : > { %v815_v63 = vsel %vm802_vm8, %v798_v42, %v598_v35  ;;  %v807_v1 = vsel %vm802_vm8, %v790_v49, %v582_v31 }
 0x141   : > { %v412_v29 = vpop.permute.xlu1 %411  ;;  %v396_v32 = vpop.permute.xlu0 %395 }
 0x142   : > { %v742_v35 = vsel %vm734_vm4, %v725_v18, %v396_v32 }
 0x145   : > { %v458_v45 = vpop.permute.xlu1 %457  ;;  %v442_v28 = vpop.permute.xlu0 %441 }
 0x146   : > { %v766_v58 = vsel %vm751_vm5, %v749_v27, %v458_v45  ;;  %v758_v62 = vsel %vm751_vm5, %v741_v54, %v442_v28  ;;  %v750_v27 = vsel %vm734_vm4, %v733_v19, %v412_v29 }
 0x149   : > { %v600_v48 = vpop.permute.xlu1 %599  ;;  %v584_v17 = vpop.permute.xlu0 %583 }
 0x14a   : > { %v816_v40 = vsel %vm802_vm8, %v799_v13, %v600_v48  ;;  %v808_v50 = vsel %vm802_vm8, %v791_v16, %v584_v17 }
 0x14d   : > { %v646_v46 = vpop.permute.xlu1 %645  ;;  %v630_v43 = vpop.permute.xlu0 %629 }
 0x14e   : > { %v832_v2 = vsel %vm819_vm9, %v815_v63, %v646_v46  ;;  %v824_v10 = vsel %vm819_vm9, %v807_v1, %v630_v43 }
 0x151   : > { %v460_v44 = vpop.permute.xlu1 %459 }
 0x152   : > { %v444_v47 = vpop.permute.xlu0 %443  ;;  %v767_v31 = vsel %vm751_vm5, %v750_v27, %v460_v44 }
 0x153   : > { %v759_v48 = vsel %vm751_vm5, %v742_v35, %v444_v47 }
 0x155   : > { %v506_v0 = vpop.permute.xlu1 %505 }
 0x156   : > { %v490_v36 = vpop.permute.xlu0 %489  ;;  %v783_v24 = vsel %vm768_vm6, %v766_v58, %v506_v0 }
 0x157   : > { %v775_v21 = vsel %vm768_vm6, %v758_v62, %v490_v36 }
 0x159   : > { %v648_v51 = vpop.permute.xlu1 %647 }
 0x15a   : > { %v632_v56 = vpop.permute.xlu0 %631  ;;  %v833_v34 = vsel %vm819_vm9, %v816_v40, %v648_v51 }
 0x15b   : > { %v825_v6 = vsel %vm819_vm9, %v808_v50, %v632_v56 }
 0x15d   : > { %v694_v3 = vpop.permute.xlu1 %693 }
 0x15e   : > { %v849_v4 = vsel %vm836_vm10, %v832_v2, %v694_v3  ;;  %v678_v8 = vpop.permute.xlu0 %677  ;;  %v1158_v2 = vld [vmem:[%s2004_s2] ss:$0 sm:$0xff] }
 0x15f   : > { %v841_v9 = vsel %vm836_vm10, %v824_v10, %v678_v8  ;;  %1228 = vmatprep.mubr.msk.f32.mxu1 %vm865_vm11, %v849_v4 }
 0x160   : > { %1216 = vmatprep.mubr.msk.f32.mxu0 %vm865_vm11, %v841_v9 }
 0x161   : > { %v508_v22 = vpop.permute.xlu1 %507 }
 0x162   : > { %v492_v23 = vpop.permute.xlu0 %491  ;;  %v784_v17 = vsel %vm768_vm6, %v767_v31, %v508_v22 }
 0x163   : > { %v776_v43 = vsel %vm768_vm6, %v759_v48, %v492_v23 }
 0x165   : > { %v554_v37 = vpop.permute.xlu1 %553 }
 0x166   : > { %v538_v39 = vpop.permute.xlu0 %537  ;;  %v800_v26 = vsel %vm785_vm7, %v783_v24, %v554_v37 }
 0x167   : > { %v792_v33 = vsel %vm785_vm7, %v775_v21, %v538_v39 }
 0x169   : > { %v696_v55 = vpop.permute.xlu1 %695 }
 0x16a   : > { %v850_v38 = vsel %vm836_vm10, %v833_v34, %v696_v55  ;;  %v680_v52 = vpop.permute.xlu0 %679 }
 0x16b   : > { %v842_v53 = vsel %vm836_vm10, %v825_v6, %v680_v52  ;;  %1229 = vmatmul.mubr.msk.f32.gmra.mrb[4].mxu1 %vm865_vm11, %v850_v38 }
 0x16c   : > { %1217 = vmatmul.mubr.msk.f32.gmra.mrb[4].mxu0 %vm865_vm11, %v842_v53 }
 0x16d   : > { %v556_v41 = vpop.permute.xlu1 %555 }
 0x16e   : > { %v540_v59 = vpop.permute.xlu0 %539  ;;  %v801_v32 = vsel %vm785_vm7, %v784_v17, %v556_v41 }
 0x16f   : > { %v793_v0 = vsel %vm785_vm7, %v776_v43, %v540_v59 }
 0x171   : > { %v602_v5 = vpop.permute.xlu1 %601 }
 0x172   : > { %v586_v7 = vpop.permute.xlu0 %585  ;;  %v817_v54 = vsel %vm802_vm8, %v800_v26, %v602_v5 }
 0x173   : > { %v809_v11 = vsel %vm802_vm8, %v792_v33, %v586_v7 }
 0x175   : > { %v604_v25 = vpop.permute.xlu1 %603 }
 0x176   : > { %v588_v14 = vpop.permute.xlu0 %587  ;;  %v818_v47 = vsel %vm802_vm8, %v801_v32, %v604_v25 }
 0x177   : > { %v810_v36 = vsel %vm802_vm8, %v793_v0, %v588_v14 }
 0x179   : > { %v650_v30 = vpop.permute.xlu1 %649 }
 0x17a   : > { %v634_v57 = vpop.permute.xlu0 %633  ;;  %v834_v45 = vsel %vm819_vm9, %v817_v54, %v650_v30 }
 0x17b   : > { %v826_v12 = vsel %vm819_vm9, %v809_v11, %v634_v57 }
 0x17d   : > { %v652_v61 = vpop.permute.xlu1 %651 }
 0x17e   : > { %v636_v20 = vpop.permute.xlu0 %635  ;;  %v835_v51 = vsel %vm819_vm9, %v818_v47, %v652_v61 }
 0x17f   : > { %v827_v42 = vsel %vm819_vm9, %v810_v36, %v636_v20 }
 0x181   : > { %v698_v28 = vpop.permute.xlu1 %697 }
 0x182   : > { %v851_v29 = vsel %vm836_vm10, %v834_v45, %v698_v28  ;;  %v682_v46 = vpop.permute.xlu0 %681 }
 0x183   : > { %v843_v44 = vsel %vm836_vm10, %v826_v12, %v682_v46  ;;  %1231 = vmatprep.mubr.msk.f32.mxu1 %vm865_vm11, %v851_v29 }
 0x184   : > { %1219 = vmatprep.mubr.msk.f32.mxu0 %vm865_vm11, %v843_v44 }
 0x185   : > { %v700_v56 = vpop.permute.xlu1 %699 }
 0x186   : > { %v852_v49 = vsel %vm836_vm10, %v835_v51, %v700_v56  ;;  %v684_v63 = vpop.permute.xlu0 %683 }
 0x187   : > { %v844_v1 = vsel %vm836_vm10, %v827_v42, %v684_v63  ;;  %1232 = vmatmul.mubr.msk.f32.gmra.mrb[6].mxu1 %vm865_vm11, %v852_v49 }
 0x188   : > { %1220 = vmatmul.mubr.msk.f32.gmra.mrb[6].mxu0 %vm865_vm11, %v844_v1 }
 0x1c2   : > { %v1224_v3 = vpop.f32.mrb[0].mxu1 }
 0x1c3   : > { %v1212_v10 = vpop.f32.mrb[0].mxu0  ;;  %v1030_v4 = vadd.f32 %v1224_v3, %v1158_v2  ;;  %v1024_v8 = vpop.f32.mrb[1].mxu1 }
 0x1c4   : > { %v990_v9 = vadd.f32 %v1212_v10, %v1158_v2  ;;  %v984_v22 = vpop.f32.mrb[1].mxu0  ;;  %v1025_v23 = vadd.f32 %v1158_v2, %v1024_v8 }
 0x1c5   : > { %v1072_v37 = vmax.f32 %v1030_v4, 0.0  ;;  %v985_v39 = vadd.f32 %v1158_v2, %v984_v22 }
 0x1c6   : > { %v1064_v13 = vmax.f32 %v990_v9, 0.0  ;;  %v1071_v16 = vmax.f32 %v1025_v23, 0.0 }
 0x1c7   : > { %1088 = vst.msk [vmem:[%s1965_s16 + $0x48] sm:$0xff] %vm734_vm4, %v1072_v37  ;;  %v1063_v40 = vmax.f32 %v985_v39, 0.0 }
 0x1c8   : > { %1080 = vst.msk [vmem:[%s1965_s16 + $0x8] sm:$0xff] %vm734_vm4, %v1064_v13  ;;  %1087 = vst.msk [vmem:[%s1965_s16 + $0x40] sm:$0xff] %vm734_vm4, %v1071_v16 }
 0x1c9   : > { %1079 = vst.msk [vmem:[%s1965_s16] sm:$0xff] %vm734_vm4, %v1063_v40 }
 0x202   : > { %v1215_v50 = vpop.f32.mrb[2].mxu0  ;;  %v1227_v34 = vpop.f32.mrb[2].mxu1 }
 0x203   : > { %v1000_v55 = vadd.f32 %v1215_v50, %v1158_v2  ;;  %v1040_v6 = vadd.f32 %v1227_v34, %v1158_v2  ;;  %v994_v38 = vpop.f32.mrb[3].mxu0  ;;  %v1034_v52 = vpop.f32.mrb[3].mxu1 }
 0x204   : > { %v995_v53 = vadd.f32 %v1158_v2, %v994_v38  ;;  %v1035_v41 = vadd.f32 %v1158_v2, %v1034_v52 }
 0x205   : > { %v1066_v59 = vmax.f32 %v1000_v55, 0.0  ;;  %v1074_v5 = vmax.f32 %v1040_v6, 0.0 }
 0x206   : > { %v1065_v7 = vmax.f32 %v995_v53, 0.0  ;;  %v1073_v25 = vmax.f32 %v1035_v41, 0.0 }
 0x207   : > { %1082 = vst.msk [vmem:[%s1965_s16 + $0x18] sm:$0xff] %vm734_vm4, %v1066_v59  ;;  %1090 = vst.msk [vmem:[%s1965_s16 + $0x58] sm:$0xff] %vm734_vm4, %v1074_v5 }
 0x208   : > { %1081 = vst.msk [vmem:[%s1965_s16 + $0x10] sm:$0xff] %vm734_vm4, %v1065_v7  ;;  %1089 = vst.msk [vmem:[%s1965_s16 + $0x50] sm:$0xff] %vm734_vm4, %v1073_v25 }
 0x23e   : > { %v1230_v14 = vpop.f32.mrb[4].mxu1 }
 0x23f   : > { %v1218_v30 = vpop.f32.mrb[4].mxu0  ;;  %v1050_v57 = vadd.f32 %v1230_v14, %v1158_v2  ;;  %v1044_v58 = vpop.f32.mrb[5].mxu1 }
 0x240   : > { %v1010_v61 = vadd.f32 %v1218_v30, %v1158_v2  ;;  %v1004_v62 = vpop.f32.mrb[5].mxu0  ;;  %v1045_v24 = vadd.f32 %v1158_v2, %v1044_v58 }
 0x241   : > { %v1076_v20 = vmax.f32 %v1050_v57, 0.0  ;;  %v1005_v60 = vadd.f32 %v1158_v2, %v1004_v62 }
 0x242   : > { %v1068_v19 = vmax.f32 %v1010_v61, 0.0  ;;  %v1075_v21 = vmax.f32 %v1045_v24, 0.0 }
 0x243   : > { %1092 = vst.msk [vmem:[%s1965_s16 + $0x68] sm:$0xff] %vm734_vm4, %v1076_v20  ;;  %v1067_v26 = vmax.f32 %v1005_v60, 0.0 }
 0x244   : > { %1084 = vst.msk [vmem:[%s1965_s16 + $0x28] sm:$0xff] %vm734_vm4, %v1068_v19  ;;  %1091 = vst.msk [vmem:[%s1965_s16 + $0x60] sm:$0xff] %vm734_vm4, %v1075_v21 }
 0x245   : > { %1083 = vst.msk [vmem:[%s1965_s16 + $0x20] sm:$0xff] %vm734_vm4, %v1067_v26 }
 0x25a   : > { %v1233_v15 = vpop.f32.mrb[6].mxu1 }
 0x25b   : > { %v1221_v18 = vpop.f32.mrb[6].mxu0  ;;  %v1060_v27 = vadd.f32 %v1233_v15, %v1158_v2  ;;  %v1054_v33 = vpop.f32.mrb[7].mxu1 }
 0x25c   : > { %v1020_v54 = vadd.f32 %v1221_v18, %v1158_v2  ;;  %v1014_v35 = vpop.f32.mrb[7].mxu0  ;;  %v1055_v31 = vadd.f32 %v1158_v2, %v1054_v33 }
 0x25d   : > { %v1078_v11 = vmax.f32 %v1060_v27, 0.0  ;;  %v1015_v45 = vadd.f32 %v1158_v2, %v1014_v35 }
 0x25e   : > { %v1070_v28 = vmax.f32 %v1020_v54, 0.0  ;;  %v1077_v48 = vmax.f32 %v1055_v31, 0.0 }
 0x25f   : > { %1094 = vst.msk [vmem:[%s1965_s16 + $0x78] sm:$0xff] %vm734_vm4, %v1078_v11  ;;  %v1069_v17 = vmax.f32 %v1015_v45, 0.0 }
 0x260   : > { %1086 = vst.msk [vmem:[%s1965_s16 + $0x38] sm:$0xff] %vm734_vm4, %v1070_v28  ;;  %1093 = vst.msk [vmem:[%s1965_s16 + $0x70] sm:$0xff] %vm734_vm4, %v1077_v48 }
 0x261   : > { %1085 = vst.msk [vmem:[%s1965_s16 + $0x30] sm:$0xff] %vm734_vm4, %v1069_v17 }
 0x262 PF: > { %s13_s12 = sadd.s32 1, %s1271_s12  }
 0x263   : > { %p10_p4 = scmp.ge.s32.totalorder %s13_s12, 6  }
 0x265   :  { %12 = sbr.rel (!%p10_p4) target bundleno = 1 (0x1), region = 62 }

</bundles_post_ra>
